<compile_context>
chip_gen: v7x
topology: tpu7x:2x2x1
jax: 0.10.0
libtpu: 0.0.40
codegen_flags: <defaults>
</compile_context>

<pallas_src>
import functools

import jax
import jax.numpy as jnp
from jax.experimental import pallas as pl
from jax.experimental.pallas import tpu as pltpu


def _round_up(x, m):
    return (x + m - 1) // m * m


def _cdiv(a, b):
    return (a + b - 1) // b


# ---------------------------------------------------------------------------
# Kernel
# ---------------------------------------------------------------------------
def block_kernel(x_ref, wt_ref, b_ref, g_ref, beta_ref, o_ref, acc_ref,
                 *, n_real_features):
    n = pl.program_id(1)          # Fout tile index
    k = pl.program_id(2)          # contraction tile index (last / fastest)
    tk, tn = wt_ref.shape
    f_pad = acc_ref.shape[1]

    n_off = pl.multiple_of(n * tn, 128)
    k_off = pl.multiple_of(k * tk, 128)

    @pl.when(k == 0)
    def _():
        acc_ref[:, pl.ds(n_off, tn)] = jnp.zeros(
            (acc_ref.shape[0], tn), jnp.float32)

    # x block is resident across the (n, k) axes; slice out this step's
    # K-chunk.  Feed the MXU in the native input dtype, accumulate in f32.
    x_k = x_ref[:, pl.ds(k_off, tk)]                          # (tm, tk)
    acc_ref[:, pl.ds(n_off, tn)] += jnp.dot(
        x_k, wt_ref[...], preferred_element_type=jnp.float32)

    is_last = jnp.logical_and(n == pl.num_programs(1) - 1,
                              k == pl.num_programs(2) - 1)

    @pl.when(is_last)
    def _():
        y = acc_ref[...] + b_ref[...].astype(jnp.float32)     # (tm, f_pad)
        # LayerNorm over the REAL feature count only.  Padded columns of y
        # are exactly zero (pack_params zero-pads W^T columns and bias), so
        # they contribute nothing to the mean; they are masked out of the
        # variance term only when padding exists (static check).
        inv_n = jnp.float32(1.0 / n_real_features)
        mean = jnp.sum(y, axis=-1, keepdims=True) * inv_n
        d = y - mean
        if n_real_features != f_pad:
            col = jax.lax.broadcasted_iota(jnp.int32, y.shape, dimension=1)
            d = jnp.where(col < n_real_features, d, jnp.float32(0.0))
        var = jnp.sum(d * d, axis=-1, keepdims=True) * inv_n  # biased, as torch
        # NOTE: zero-padded rows give var == 0 -> rsqrt(1e-5); finite, and
        # those rows are discarded by the wrapper, so this is intentional.
        y_norm = d * jax.lax.rsqrt(var + 1e-5)
        y_norm = (y_norm * g_ref[...].astype(jnp.float32)
                  + beta_ref[...].astype(jnp.float32))
        out = jnp.tanh(y_norm) + x_ref[...].astype(jnp.float32)   # residual
        o_ref[...] = out.astype(o_ref.dtype)


# ---------------------------------------------------------------------------
# Parameter packing (one-time, at init)
# ---------------------------------------------------------------------------
def pack_params(weight, bias, gamma, beta, param_dtype=None):
    """Zero-pad the feature axes to 128 lanes and store W^T.

    W^T (Fin_pad, Fout_pad) makes the kernel's MXU contraction a plain
    (tm,tk)@(tk,tn) with a K-major RHS -- no per-step XLU transpose.
    Padded columns of W^T / bias / gamma / beta are zero, which the kernel's
    LayerNorm mean relies on.  `param_dtype` (e.g. jnp.bfloat16) optionally
    halves HBM weight traffic; accumulation stays f32.
    """
    fout, fin = weight.shape
    f_pad = _round_up(max(fin, fout), 128)
    w_dtype = param_dtype if param_dtype is not None else weight.dtype
    wt_p = jnp.zeros((f_pad, f_pad), w_dtype).at[:fin, :fout].set(
        weight.T.astype(w_dtype))
    b_p = jnp.zeros((1, f_pad), jnp.float32).at[:, :fout].set(
        bias.reshape(1, fout).astype(jnp.float32))
    g_p = jnp.zeros((1, f_pad), jnp.float32).at[:, :fout].set(
        gamma.reshape(1, fout).astype(jnp.float32))
    be_p = jnp.zeros((1, f_pad), jnp.float32).at[:, :fout].set(
        beta.reshape(1, fout).astype(jnp.float32))
    return wt_p, b_p, g_p, be_p, f_pad


# ---------------------------------------------------------------------------
# Generation-aware tile / VMEM selection
# ---------------------------------------------------------------------------
def _vmem_budget_bytes():
    cap = None
    try:
        cap = getattr(pltpu.get_tpu_info(), "vmem_capacity_bytes", None)
    except Exception:
        cap = None
    if not cap:
        cap = 64 * 1024 * 1024      # conservative (v7x physical)
    return int(cap * 3 // 4)        # headroom for Mosaic internal scratch


def _fits(tm, tk, tn, f_pad, x_bytes, w_bytes, budget):
    x_blk = 2 * tm * f_pad * x_bytes       # double-buffered x rows
    o_blk = 2 * tm * f_pad * x_bytes       # double-buffered out rows
    w_blk = 2 * tk * tn * w_bytes          # double-buffered W^T tile
    acc = tm * f_pad * 4                   # f32 accumulator scratch
    epi = 3 * tm * f_pad * 4               # epilogue temporaries (y, d, y_norm)
    vecs = 6 * f_pad * 4                   # bias / gamma / beta
    return x_blk + o_blk + w_blk + acc + epi + vecs <= budget


def _feature_tiles(f_pad, cap=512):
    tiles = [t for t in range(128, min(cap, f_pad) + 1, 128) if f_pad % t == 0]
    return sorted(tiles, reverse=True) or [128]


def _choose_tiles(n_rows, f_pad, x_bytes, w_bytes, row_align, budget):
    f_tiles = _feature_tiles(f_pad)
    # Row-tile candidates: balanced tiles that minimize padding, prefer big
    # tm (weight re-stream per row tile ~ 1/tm), and keep >= 2 row tiles when
    # rows permit so both v7x TensorCores get work.
    tm_candidates = []
    for tm_cap in (1024, 512, 256, 128, 64, 32, 16, 8):
        cap = min(tm_cap, _round_up(n_rows, row_align))
        ntiles = max(1, _cdiv(n_rows, cap))
        if ntiles == 1 and n_rows > row_align:
            ntiles = 2
        tm = _round_up(_cdiv(n_rows, ntiles), row_align)
        if tm not in tm_candidates:
            tm_candidates.append(tm)
    for tm in tm_candidates:
        for tk in f_tiles:
            for tn in f_tiles:
                if _fits(tm, tk, tn, f_pad, x_bytes, w_bytes, budget):
                    return tm, tk, tn
    return row_align, 128, 128   # last resort; tiny tiles always fit


# ---------------------------------------------------------------------------
# Forward wrapper
# ---------------------------------------------------------------------------
def block_forward(x, wt_p, b_p, g_p, be_p, n_features):
    """x: (..., n_features).  Packed params from pack_params.  Returns same shape."""
    orig_shape = x.shape
    fin = orig_shape[-1]
    assert fin == n_features, "residual requires n_features_in == n_features_out"
    f_pad = wt_p.shape[0]

    x2d = x.reshape(-1, fin)
    n_rows = x2d.shape[0]

    x_bytes = jnp.dtype(x.dtype).itemsize
    w_bytes = jnp.dtype(wt_p.dtype).itemsize
    row_align = max(8, 32 // x_bytes)      # 8 for f32, 16 for bf16, 32 for int8

    budget = _vmem_budget_bytes()
    tm, tk, tn = _choose_tiles(n_rows, f_pad, x_bytes, w_bytes, row_align, budget)
    rows_pad = _round_up(n_rows, tm)

    needs_pad = (rows_pad != n_rows) or (f_pad != fin)
    if needs_pad:
        x_p = jnp.zeros((rows_pad, f_pad), x.dtype).at[:n_rows, :fin].set(x2d)
    else:
        x_p = x2d                           # aligned: no extra HBM round trip

    kernel = functools.partial(block_kernel, n_real_features=n_features)

    out = pl.pallas_call(
        kernel,
        out_shape=jax.ShapeDtypeStruct((rows_pad, f_pad), x.dtype),
        grid_spec=pltpu.PrefetchScalarGridSpec(
            num_scalar_prefetch=0,
            grid=(rows_pad // tm, f_pad // tn, f_pad // tk),
            in_specs=[
                # x rows: resident across (n, k)
                pl.BlockSpec((tm, f_pad), lambda i, n, k: (i, 0)),
                # W^T (Fin_pad, Fout_pad): tiled over K (rows) and Fout (cols)
                pl.BlockSpec((tk, tn), lambda i, n, k: (k, n)),
                pl.BlockSpec((1, f_pad), lambda i, n, k: (0, 0)),   # bias
                pl.BlockSpec((1, f_pad), lambda i, n, k: (0, 0)),   # ln gamma
                pl.BlockSpec((1, f_pad), lambda i, n, k: (0, 0)),   # ln beta
            ],
            out_specs=pl.BlockSpec((tm, f_pad), lambda i, n, k: (i, 0)),
            scratch_shapes=[pltpu.VMEM((tm, f_pad), jnp.float32)],
        ),
        compiler_params=pltpu.CompilerParams(
            dimension_semantics=("parallel", "arbitrary", "arbitrary"),
            vmem_limit_bytes=int(budget)),
    )(x_p, wt_p, b_p, g_p, be_p)

    if needs_pad:
        out = out[:n_rows, :fin]
    return out.reshape(orig_shape)


# ---------------------------------------------------------------------------
# Init matching the PyTorch module's weights_init
# ---------------------------------------------------------------------------
def init_params(key, n_features_in, n_features_out):
    # weights_init: Linear -> xavier_uniform_ weight, bias = 0.
    # LayerNorm class name matches none of the branches -> default init
    # (weight = 1, bias = 0).
    bound = (6.0 / (n_features_in + n_features_out)) ** 0.5
    weight = jax.random.uniform(
        key, (n_features_out, n_features_in),
        minval=-bound, maxval=bound, dtype=jnp.float32)
    bias = jnp.zeros((n_features_out,), jnp.float32)
    gamma = jnp.ones((n_features_out,), jnp.float32)
    beta = jnp.zeros((n_features_out,), jnp.float32)
    return weight, bias, gamma, beta


if __name__ == "__main__":
    key = jax.random.PRNGKey(0)
    k_w, k_x = jax.random.split(key)

    batch, seq, hidden = 2, 8, 32       # n_features_in == n_features_out == 32
    weight, bias, gamma, beta = init_params(k_w, hidden, hidden)
    # Pack / pad / transpose parameters once (init-time), not per forward call.
    # (Pass param_dtype=jnp.bfloat16 here to halve weight HBM traffic if
    # numerics allow; kept f32 to match the f32 reference exactly.)
    wt_p, b_p, g_p, be_p, _ = pack_params(weight, bias, gamma, beta)

    x = jax.random.normal(k_x, (batch, seq, hidden), dtype=jnp.float32)

    out = block_forward(x, wt_p, b_p, g_p, be_p, hidden)
    jax.block_until_ready(out)

    # pure-JAX reference check (PyTorch Block semantics)
    y = x @ weight.T + bias
    mean = jnp.mean(y, axis=-1, keepdims=True)
    var = jnp.mean((y - mean) ** 2, axis=-1, keepdims=True)
    yn = (y - mean) * jax.lax.rsqrt(var + 1e-5) * gamma + beta
    ref = jnp.tanh(yn) + x
    assert out.shape == (batch, seq, hidden)
    assert jnp.max(jnp.abs(out - ref)) < 1e-4

    print("KERNEL_OK")
</pallas_src>

<mosaic_0001>
module attributes {stable_mosaic.version = 11 : i64} {
  func.func @block_kernel(%arg0: i32, %arg1: i32, %arg2: i32, %arg3: memref<8x128xf32, #tpu.memory_space<vmem>>, %arg4: memref<128x128xf32, #tpu.memory_space<vmem>>, %arg5: memref<1x128xf32, #tpu.memory_space<vmem>>, %arg6: memref<1x128xf32, #tpu.memory_space<vmem>>, %arg7: memref<1x128xf32, #tpu.memory_space<vmem>>, %arg8: memref<8x128xf32, #tpu.memory_space<vmem>>, %arg9: memref<8x128xf32, #tpu.memory_space<vmem>>) attributes {dimension_semantics = [#tpu.dimension_semantics<parallel>, #tpu.dimension_semantics<arbitrary>, #tpu.dimension_semantics<arbitrary>], iteration_bounds = array<i64: 2, 1, 1>, scalar_prefetch = 0 : i64, scratch_operands = 1 : i64, tpu.core_type = #tpu.core_type<tc>, window_params = [{transform_indices = @transform_0, window_bounds = array<i64: 8, 128>}, {transform_indices = @transform_1, window_bounds = array<i64: 128, 128>}, {pipeline_mode = #tpu.pipeline_mode<synchronous>, transform_indices = @transform_2, window_bounds = array<i64: 1, 128>}, {pipeline_mode = #tpu.pipeline_mode<synchronous>, transform_indices = @transform_3, window_bounds = array<i64: 1, 128>}, {pipeline_mode = #tpu.pipeline_mode<synchronous>, transform_indices = @transform_4, window_bounds = array<i64: 1, 128>}, {transform_indices = @transform_5, window_bounds = array<i64: 8, 128>}]} {
    %c128_i32 = arith.constant 128 : i32
    %0 = arith.muli %arg1, %c128_i32 : i32
    %1 = tpu.assume_multiple %0, 128 : i32
    %c128_i32_0 = arith.constant 128 : i32
    %2 = arith.muli %arg2, %c128_i32_0 : i32
    %3 = tpu.assume_multiple %2, 128 : i32
    %c0_i32 = arith.constant 0 : i32
    %4 = arith.cmpi eq, %arg2, %c0_i32 : i32
    %5 = arith.extui %4 : i1 to i32
    %c0_i32_1 = arith.constant 0 : i32
    %6 = arith.cmpi ne, %5, %c0_i32_1 : i32
    scf.if %6 {
      %cst_9 = arith.constant 0.000000e+00 : f32
      %21 = vector.broadcast %cst_9 : f32 to vector<8x128xf32>
      %c0_10 = arith.constant 0 : index
      %22 = arith.index_cast %1 : i32 to index
      %23 = vector.load %arg9[%c0_10, %22] : memref<8x128xf32, #tpu.memory_space<vmem>>, vector<8x128xf32>
      tpu.vector_store %arg9[%c0_10, %22], %21 {strides = array<i32>} : memref<8x128xf32, #tpu.memory_space<vmem>>, vector<8x128xf32>,
    } else {
    }
    %c0 = arith.constant 0 : index
    %7 = arith.index_cast %3 : i32 to index
    %8 = vector.load %arg3[%c0, %7] : memref<8x128xf32, #tpu.memory_space<vmem>>, vector<8x128xf32>
    %c0_2 = arith.constant 0 : index
    %9 = arith.index_cast %1 : i32 to index
    %10 = vector.load %arg9[%c0_2, %9] : memref<8x128xf32, #tpu.memory_space<vmem>>, vector<8x128xf32>
    %c0_3 = arith.constant 0 : index
    %c0_4 = arith.constant 0 : index
    %11 = vector.load %arg4[%c0_3, %c0_4] : memref<128x128xf32, #tpu.memory_space<vmem>>, vector<128x128xf32>
    %cst = arith.constant dense<0.000000e+00> : vector<8x128xf32>
    %12 = tpu.matmul %8, %11, %cst {dimension_numbers = #tpu.dot_dimension_numbers<[1], [0], [0], [1], [0, 0, 1, 1], [], []>} : vector<8x128xf32>, vector<128x128xf32>, vector<8x128xf32> -> vector<8x128xf32>
    %13 = arith.addf %10, %12 : vector<8x128xf32>
    %c0_5 = arith.constant 0 : index
    %14 = arith.index_cast %1 : i32 to index
    %15 = vector.load %arg9[%c0_5, %14] : memref<8x128xf32, #tpu.memory_space<vmem>>, vector<8x128xf32>
    tpu.vector_store %arg9[%c0_5, %14], %13 {strides = array<i32>} : memref<8x128xf32, #tpu.memory_space<vmem>>, vector<8x128xf32>,
    %c0_i32_6 = arith.constant 0 : i32
    %16 = arith.cmpi eq, %arg1, %c0_i32_6 : i32
    %c0_i32_7 = arith.constant 0 : i32
    %17 = arith.cmpi eq, %arg2, %c0_i32_7 : i32
    %18 = arith.andi %16, %17 : i1
    %19 = arith.extui %18 : i1 to i32
    %c0_i32_8 = arith.constant 0 : i32
    %20 = arith.cmpi ne, %19, %c0_i32_8 : i32
    scf.if %20 {
      %c0_9 = arith.constant 0 : index
      %c0_10 = arith.constant 0 : index
      %21 = vector.load %arg9[%c0_9, %c0_10] : memref<8x128xf32, #tpu.memory_space<vmem>>, vector<8x128xf32>
      %c0_11 = arith.constant 0 : index
      %c0_12 = arith.constant 0 : index
      %22 = vector.load %arg5[%c0_11, %c0_12] : memref<1x128xf32, #tpu.memory_space<vmem>>, vector<1x128xf32>
      %23 = vector.broadcast %22 : vector<1x128xf32> to vector<8x128xf32>
      %24 = arith.addf %21, %23 : vector<8x128xf32>
      %cst_13 = arith.constant dense<0.000000e+00> : vector<8xf32>
      %25 = vector.multi_reduction <add>, %24, %cst_13 [1] : vector<8x128xf32> to vector<8xf32>
      %26 = vector.shape_cast %25 : vector<8xf32> to vector<8x1xf32>
      %cst_14 = arith.constant 3.125000e-02 : f32
      %27 = vector.broadcast %cst_14 : f32 to vector<8x1xf32>
      %28 = arith.mulf %26, %27 : vector<8x1xf32>
      %29 = vector.broadcast %28 : vector<8x1xf32> to vector<8x128xf32>
      %30 = arith.subf %24, %29 : vector<8x128xf32>
      %31 = tpu.iota {dimensions = array<i32: 1>} : vector<8x128xi32>
      %c32_i32 = arith.constant 32 : i32
      %32 = vector.broadcast %c32_i32 : i32 to vector<8x128xi32>
      %33 = arith.cmpi slt, %31, %32 : vector<8x128xi32>
      %cst_15 = arith.constant 0.000000e+00 : f32
      %34 = vector.broadcast %cst_15 : f32 to vector<8x128xf32>
      %35 = arith.select %33, %30, %34 : vector<8x128xi1>, vector<8x128xf32>
      %36 = arith.mulf %35, %35 : vector<8x128xf32>
      %cst_16 = arith.constant dense<0.000000e+00> : vector<8xf32>
      %37 = vector.multi_reduction <add>, %36, %cst_16 [1] : vector<8x128xf32> to vector<8xf32>
      %38 = vector.shape_cast %37 : vector<8xf32> to vector<8x1xf32>
      %cst_17 = arith.constant 3.125000e-02 : f32
      %39 = vector.broadcast %cst_17 : f32 to vector<8x1xf32>
      %40 = arith.mulf %38, %39 : vector<8x1xf32>
      %cst_18 = arith.constant 9.99999974E-6 : f32
      %41 = vector.broadcast %cst_18 : f32 to vector<8x1xf32>
      %42 = arith.addf %40, %41 : vector<8x1xf32>
      %43 = math.rsqrt %42 : vector<8x1xf32>
      %44 = vector.broadcast %43 : vector<8x1xf32> to vector<8x128xf32>
      %45 = arith.mulf %35, %44 : vector<8x128xf32>
      %c0_19 = arith.constant 0 : index
      %c0_20 = arith.constant 0 : index
      %46 = vector.load %arg6[%c0_19, %c0_20] : memref<1x128xf32, #tpu.memory_space<vmem>>, vector<1x128xf32>
      %47 = vector.broadcast %46 : vector<1x128xf32> to vector<8x128xf32>
      %48 = arith.mulf %45, %47 : vector<8x128xf32>
      %c0_21 = arith.constant 0 : index
      %c0_22 = arith.constant 0 : index
      %49 = vector.load %arg7[%c0_21, %c0_22] : memref<1x128xf32, #tpu.memory_space<vmem>>, vector<1x128xf32>
      %50 = vector.broadcast %49 : vector<1x128xf32> to vector<8x128xf32>
      %51 = arith.addf %48, %50 : vector<8x128xf32>
      %52 = math.tanh %51 : vector<8x128xf32>
      %c0_23 = arith.constant 0 : index
      %c0_24 = arith.constant 0 : index
      %53 = vector.load %arg3[%c0_23, %c0_24] : memref<8x128xf32, #tpu.memory_space<vmem>>, vector<8x128xf32>
      %54 = arith.addf %52, %53 : vector<8x128xf32>
      %c0_25 = arith.constant 0 : index
      %c0_26 = arith.constant 0 : index
      %55 = vector.load %arg8[%c0_25, %c0_26] : memref<8x128xf32, #tpu.memory_space<vmem>>, vector<8x128xf32>
      tpu.vector_store %arg8[%c0_25, %c0_26], %54 {strides = array<i32>} : memref<8x128xf32, #tpu.memory_space<vmem>>, vector<8x128xf32>,
    } else {
    }
    return
  }
  func.func @transform_0(%arg0: i32, %arg1: i32, %arg2: i32) -> (i32, i32) {
    %c0_i32 = arith.constant 0 : i32
    %c0_i32_0 = arith.constant 0 : i32
    return %arg0, %c0_i32 : i32, i32
  }
  func.func @transform_1(%arg0: i32, %arg1: i32, %arg2: i32) -> (i32, i32) {
    %c0_i32 = arith.constant 0 : i32
    return %arg2, %arg1 : i32, i32
  }
  func.func @transform_2(%arg0: i32, %arg1: i32, %arg2: i32) -> (i32, i32) {
    %c0_i32 = arith.constant 0 : i32
    %c0_i32_0 = arith.constant 0 : i32
    %c0_i32_1 = arith.constant 0 : i32
    return %c0_i32, %c0_i32_0 : i32, i32
  }
  func.func @transform_3(%arg0: i32, %arg1: i32, %arg2: i32) -> (i32, i32) {
    %c0_i32 = arith.constant 0 : i32
    %c0_i32_0 = arith.constant 0 : i32
    %c0_i32_1 = arith.constant 0 : i32
    return %c0_i32, %c0_i32_0 : i32, i32
  }
  func.func @transform_4(%arg0: i32, %arg1: i32, %arg2: i32) -> (i32, i32) {
    %c0_i32 = arith.constant 0 : i32
    %c0_i32_0 = arith.constant 0 : i32
    %c0_i32_1 = arith.constant 0 : i32
    return %c0_i32, %c0_i32_0 : i32, i32
  }
  func.func @transform_5(%arg0: i32, %arg1: i32, %arg2: i32) -> (i32, i32) {
    %c0_i32 = arith.constant 0 : i32
    %c0_i32_0 = arith.constant 0 : i32
    return %arg0, %c0_i32 : i32, i32
  }
}

</mosaic_0001>

<bundles_post_ra>
// kernel: tpu_custom_call.1
= control target key start
LH: loop header
LB: loop body
LE: loop exit
PB: predicated region body
PF: predicated region fallthrough
CT: control target
= control target key end

     0   :  { %10 = vsyncpa [#allocation4], 0  ;;  %s1143_s0 = inlined_call_operand.hbm [shape: f32[16,128], index: 0, kind: input, shape index: {}]   ;;  %s1144_s1 = inlined_call_operand.hbm [shape: f32[128,128], index: 1, kind: input, shape index: {}]   ;;  %s1145_s2 = inlined_call_operand.vmem [shape: f32[1,128], index: 2, kind: input, shape index: {}]   ;;  %s1146_s3 = inlined_call_operand.vmem [shape: f32[1,128], index: 3, kind: input, shape index: {}]   ;;  %s1147_s4 = inlined_call_operand.vmem [shape: f32[1,128], index: 4, kind: input, shape index: {}]   ;;  %s1148_s5 = inlined_call_operand.hbm [shape: f32[16,128], index: 5, kind: output, shape index: {}]  }
   0x1   :  { %12 = vsyncpa [#allocation4 + $0x1], 0 }
   0x2   :  { %13 = vsyncpa [#allocation7], 0 }
   0x3   :  { %14 = vsyncpa [#allocation5], 0 }
   0x4   :  { %16 = vsyncpa [#allocation5 + $0x1], 0  ;;  %s913_s18 = smov 0   ;;  %s915_s19 = smov 0  }
   0x5   :  { %s917_s20 = smov 0   ;;  %s919_s21 = smov 0  }
   0x6   :  { %s921_s22 = smov 0   ;;  %s923_s23 = smov 0  }
   0x7 LB: > { %s553_s24 = sadd.s32 4294967295, %s873_s23   ;;  %s554_s25 = sadd.s32 4294967294, %s873_s23   ;;  %s873_s23 = sphi %s923_s23, %s22_s23   ;;  %s869_s22 = sphi %s921_s22, %s1172_s22   ;;  %s865_s21 = sphi %s919_s21, %s1171_s21   ;;  %s861_s20 = sphi %s917_s20, %s1170_s20   ;;  %s857_s19 = sphi %s915_s19, %s1169_s19   ;;  %s853_s18 = sphi %s913_s18, %s1168_s18  }
   0x8   : > { %p61_p0 = scmp.ne.s32.totalorder %s857_s19, %s853_s18  ;;  %p947_p1 = scmp.eq.s32.totalorder %s553_s24, 0 }
   0x9   : > { %p951_p2 = scmp.eq.s32.totalorder %s553_s24, 1  ;;  %p182_p3 = scmp.eq.s32.totalorder %s554_s25, 1 }
   0xa   : > { %s1153_s26 = scalar_select %p947_p1, 1, 0 }
   0xb   : > { %s1154_s27 = scalar_select %p951_p2, 1, 0 }
   0xc   : > { %p957_p4 = por %p947_p1, %p61_p0  ;;  %p555_p5 = scmp.ge.s32.totalorder %s873_s23, 1 }
   0xd   : > { %p962_p6 = por %p182_p3, %p61_p0  ;;  %p189_p7 = scmp.lt.s32.totalorder %s873_s23, 3 }
   0xe   : > { %s1155_s28 = scalar_select %p957_p4, 1, 0 }
   0xf   : > { %s1156_s29 = scalar_select %p962_p6, 1, 0 }
  0x10   : > { %p967_p8 = pnand %p555_p5, %p189_p7  ;;  %s875_s6 = smov [#allocation6]  }
  0x11   : > { %s205_s7 = sshll.u32 %s875_s6, 4  ;;  %s41_s9 = sadd.s32 1, %s869_s22  ;;  %s206_s7 = int_to_ptr.vmem [resolvable:$true] %s205_s7 }
  0x12   : > { %s1157_s30 = scalar_select %p967_p8, 1, 0 }
  0x13   : > { %p655_p9 = pneg %p967_p8  ;;  %s729_s12 = scalar_lea.hbm %s1144_s1, 2048 }
  0x14   : > { %p730_p12 = scmp.ne.s32.totalorder %s1144_s1, %s729_s12  ;;  %p736_p5 = scmp.lt.u32.totalorder %s729_s12, %s1144_s1 }
  0x15   : > { %p976_p11 = pnand %p655_p9, %p947_p1 }
  0x17   : > { %p731_p13 = pneg %p976_p11 }
  0x19   : > { %p732_p0 = pnand %p731_p13, %p730_p12 }
  0x1b   : > { %p733_p3 = pneg %p732_p0 }
  0x1d   : > { %p738_p7 = pnand %p736_p5, %p733_p3 }
  0x1f   : > { %741 = shalt.err (!%p738_p7)
}
  0x20   : > { %s742_s17 = scalar_lea.vmem %s206_s7, 2048  ;;  %p750_p1 = scmp.lt.s32.totalorder %s206_s7, %s206_s7 }
  0x21   : > { %p743_p9 = scmp.ne.s32.totalorder %s206_s7, %s742_s17  ;;  %p751_p4 = scmp.lt.s32.totalorder %s742_s17, %s742_s17 }
  0x23   : > { %p745_p10 = pnand %p743_p9, %p731_p13  ;;  %p752_p8 = por %p751_p4, %p750_p1 }
  0x25   : > { %p746_p6 = pneg %p745_p10 }
  0x27   : > { %p753_p2 = pnand %p752_p8, %p746_p6 }
  0x29   : > { %756 = shalt.err (!%p753_p2)
}
  0x2a   : > { %s876_s24 = smov 128   ;;  %s877_s25 = smov 8  }
  0x2b   : > { %658 = dma.hbm_to_vmem [thread:$0]  (!%p976_p11), %s1144_s1, 2048, %s206_s7, [#allocation7], %s876_s24, %s876_s24, %s877_s25  }
  0x2c   : > { %p43_p1 = scmp.ge.s32.totalorder %s41_s9, 2  ;;  %s48_s11 = sadd.s32 1, %s861_s20 }
  0x2d   : > { %p55_p2 = scmp.ne.s32.totalorder %s861_s20, %s857_s19  ;;  %p56_p4 = scmp.eq.s32.totalorder %s873_s23, 0 }
  0x2e   : > { %s1174_s9 = smov (%p43_p1, %s41_s9), 0  ;;  %p1160_p8 = scmp.ne.s32.totalorder %s1154_s27, 0 }
  0x2f   : > { %p1003_p6 = por %p56_p4, %p55_p2  ;;  %s45_s8 = ssub.s32 %s869_s22, %s1174_s9 }
  0x30   : > { %p1009_p10 = por %p1160_p8, %p55_p2  ;;  %p668_p12 = scmp.lt.s32.totalorder %s873_s23, 2 }
  0x31   : > { %p46_p11 = scmp.eq.s32.totalorder %s45_s8, 0  ;;  %s228_s7 = sand.u32 1, %s861_s20  }
  0x32   : > { %s558_s14 = sshll.u32 %s228_s7, 3  ;;  %s559_s16 = sshll.u32 %s869_s22, 7 }
  0x33   : > { %s1018_s15 = scalar_select %p46_p11, %s861_s20, %s48_s11  }
  0x34   : > { %s1024_s25 = scalar_lea.hbm %s1143_s0, %s559_s16  ;;  %s232_s27 = scalar_lea.vmem [#allocation3], %s558_s14 }
  0x35   : > { %s239_s6 = sshll.u32 %s232_s27, 4  ;;  %p1030_p13 = pnand %p668_p12, %p1003_p6  ;;  %s1026_s6 = int_to_ptr.vmem [resolvable:$true] %s239_s6 }
  0x36   : > { %s229_s11 = scalar_lea.sflag [#allocation4], %s228_s7  ;;  %s757_s8 = scalar_lea.hbm %s1024_s25, 128 }
  0x37   : > { %p758_p0 = scmp.ne.s32.totalorder %s1024_s25, %s757_s8  ;;  %p759_p3 = pneg %p1030_p13 }
  0x38   : > { %s762_s17 = scalar_lea.hbm %s1143_s0, 256  ;;  %p763_p9 = scmp.lt.u32.totalorder %s1024_s25, %s1143_s0 }
  0x39   : > { %p760_p5 = pnand %p759_p3, %p758_p0  ;;  %p764_p1 = scmp.lt.u32.totalorder %s762_s17, %s757_s8 }
  0x3a   : > { %p766_p4 = scmp.lt.u32.totalorder %s757_s8, %s1024_s25 }
  0x3b   : > { %p761_p7 = pneg %p760_p5  ;;  %p765_p2 = por %p764_p1, %p763_p9 }
  0x3d   : > { %p767_p6 = por %p766_p4, %p765_p2 }
  0x3f   : > { %p768_p8 = pnand %p767_p6, %p761_p7 }
  0x41   : > { %771 = shalt.err (!%p768_p8)
}
  0x42   : > { %s772_s7 = scalar_lea.vmem %s1026_s6, 128  ;;  %s878_s27 = smov [#allocation3]  }
  0x43   : > { %p773_p12 = scmp.ne.s32.totalorder %s1026_s6, %s772_s7  ;;  %s777_s14 = sshll.u32 %s878_s27, 4  ;;  %s778_s14 = int_to_ptr.vmem [resolvable:$false] %s777_s14 }
  0x44   : > { %s779_s16 = scalar_lea.vmem %s778_s14, 256  ;;  %p780_p5 = scmp.lt.s32.totalorder %s1026_s6, %s778_s14 }
  0x45   : > { %p775_p11 = pnand %p773_p12, %p759_p3  ;;  %p781_p9 = scmp.lt.s32.totalorder %s779_s16, %s772_s7 }
  0x47   : > { %p776_p0 = pneg %p775_p11  ;;  %p782_p1 = por %p781_p9, %p780_p5 }
  0x49   : > { %p783_p2 = pnand %p782_p1, %p776_p0 }
  0x4b   : > { %786 = shalt.err (!%p783_p2)
}
  0x4c   : > { %662 = dma.hbm_to_vmem [thread:$0]  (!%p1030_p13), %s1024_s25, 128, %s1026_s6, %s229_s11  }
  0x4d   : > { %p1163_p7 = scmp.ne.s32.totalorder %s1157_s30, 0 }
  0x4e   : > { %s1062_s8 = sand.u32 (!%p1163_p7), 1, %s857_s19   ;;  %p1164_p3 = scmp.ne.s32.totalorder (!%p1163_p7), %s1155_s28, 0 }
  0x4f   : > { %248 = sbr.rel (%p1163_p7) target bundleno = 678 (0x2a6), region = 40  ;;  %s561_s17 = sshll.u32 (!%p1163_p7), %s1062_s8, 3 }
  0x50   : > { %s251_s12 = scalar_lea.sflag (!%p1163_p7), [#allocation4], %s1062_s8  ;;  %s1068_s24 = scalar_lea.vmem (!%p1163_p7), [#allocation3], %s561_s17 }
  0x56   : > { %840 = dma.done.wait (%p1164_p3), %s251_s12, 128  }
  0x57   : > { %842 = vsyncadd (%p1164_p3), %s251_s12, 4294967168  ;;  %p1165_p13 = scmp.ne.s32.totalorder %s1153_s26, 0 }
  0x59   : > { %844 = dma.done.wait (%p1165_p13), [#allocation7], 2048  }
  0x5a   : > { %846 = vsyncadd (%p1165_p13), [#allocation7], 4294965248  ;;  %v879_v0 = vmov 0.0|0.0   ;;  %vm880_vm0 = vmmov 0   ;;  %v881_v1 = vmov 0.0   ;;  %v304_v2 = vld [vmem:[#allocation6] sm:$0xff]  ;;  %v410_v31 = vlaneseq }
  0x5b   : > { %623 = vmatprep.subr.bf16.mxu0 %v879_v0  ;;  %620 = vmatprep.mubr.msk.f32.mxu0 %vm880_vm0, %v881_v1  ;;  %v305_v3 = vld [vmem:[#allocation6 + $0x8] sm:$0xff]  ;;  %v306_v4 = vld [vmem:[#allocation6 + $0x10] sm:$0xff]  ;;  %v307_v6 = vld [vmem:[#allocation6 + $0x18] sm:$0xff]  ;;  %s568_s11 = sshll.u32 %s865_s21, 7  ;;  %s284_s7 = scalar_lea.vmem [#allocation8], %s561_s17 }
  0x5c   : > { %v624_v5 = vpack.c.bf16 %v305_v3, %v304_v2  ;;  %v627_v7 = vpack.c.bf16 %v307_v6, %v306_v4  ;;  %v308_v8 = vld [vmem:[#allocation6 + $0x20] sm:$0xff]  ;;  %v309_v9 = vld [vmem:[#allocation6 + $0x28] sm:$0xff]  ;;  %v310_v11 = vld [vmem:[#allocation6 + $0x30] sm:$0xff]  ;;  %v411_v32 = vand.u32 127, %v410_v31  ;;  %s455_s27 = sshll.u32 %s284_s7, 4  ;;  %s1094_s12 = scalar_lea.hbm %s1148_s5, %s568_s11  ;;  %s1096_s27 = int_to_ptr.vmem [resolvable:$true] %s455_s27 }
  0x5d   : > { %v630_v10 = vpack.c.bf16 %v309_v9, %v308_v8  ;;  %v311_v12 = vld [vmem:[#allocation6 + $0x38] sm:$0xff]  ;;  %v312_v14 = vld [vmem:[#allocation6 + $0x40] sm:$0xff]  ;;  %v313_v15 = vld [vmem:[#allocation6 + $0x48] sm:$0xff]  ;;  %s787_s26 = scalar_lea.vmem %s1096_s27, 128  ;;  %s882_s21 = smov [#allocation8]  }
  0x5e   : > { %625 = vmatpush3.bf16.msra.mxu0 %v624_v5  ;;  %v633_v13 = vpack.c.bf16 %v311_v12, %v310_v11  ;;  %v636_v16 = vpack.c.bf16 %v313_v15, %v312_v14  ;;  %v314_v17 = vld [vmem:[#allocation6 + $0x50] sm:$0xff]  ;;  %v315_v18 = vld [vmem:[#allocation6 + $0x58] sm:$0xff]  ;;  %v316_v20 = vld [vmem:[#allocation6 + $0x60] sm:$0xff]  ;;  %vm412_vm1 = vcmp.lt.s32.totalorder %v411_v32, 32  ;;  %p788_p4 = scmp.ne.s32.totalorder %s1096_s27, %s787_s26  ;;  %s791_s17 = sshll.u32 %s882_s21, 4  ;;  %s792_s17 = int_to_ptr.vmem [resolvable:$false] %s791_s17 }
  0x5f   : > { %626 = vmatprep.subr.bf16.mxu0 %v879_v0  ;;  %v639_v19 = vpack.c.bf16 %v315_v18, %v314_v17  ;;  %v317_v21 = vld [vmem:[#allocation6 + $0x68] sm:$0xff]  ;;  %v318_v23 = vld [vmem:[#allocation6 + $0x70] sm:$0xff]  ;;  %v319_v24 = vld [vmem:[#allocation6 + $0x78] sm:$0xff]  ;;  %s793_s28 = scalar_lea.vmem %s792_s17, 256  ;;  %p794_p12 = scmp.lt.s32.totalorder %s1096_s27, %s792_s17 }
  0x60   : > { %v642_v22 = vpack.c.bf16 %v317_v21, %v316_v20  ;;  %v645_v25 = vpack.c.bf16 %v319_v24, %v318_v23  ;;  %v299_v26 = vld [vmem:[%s1068_s24] sm:$0xff]  ;;  %s442_s24 = scalar_lea.sflag [#allocation5], %s1062_s8  ;;  %p789_p6 = pnand %p788_p4, %p1009_p10 }
  0x61   : > { %v564_v27 = vld [vmem:[%s1145_s2] ss:$0 sm:$0xff]  ;;  %p795_p11 = scmp.lt.s32.totalorder %s793_s28, %s787_s26 }
  0x62   : > { %628 = vmatpush3.bf16.msra.mxu0 %v627_v7  ;;  %v565_v42 = vld [vmem:[%s1146_s3] ss:$0 sm:$0xff]  ;;  %p790_p8 = pneg %p789_p6 }
  0x63   : > { %629 = vmatprep.subr.bf16.mxu0 %v879_v0  ;;  %v566_v44 = vld [vmem:[%s1147_s4] ss:$0 sm:$0xff]  ;;  %p796_p0 = por %p795_p11, %p794_p12 }
  0x65   : > { %p797_p5 = pnand %p796_p0, %p790_p8 }
  0x66   : > { %631 = vmatpush3.bf16.msra.mxu0 %v630_v10 }
  0x67   : > { %632 = vmatprep.subr.bf16.mxu0 %v879_v0 }
  0x6a   : > { %634 = vmatpush3.bf16.msra.mxu0 %v633_v13 }
  0x6b   : > { %635 = vmatprep.subr.bf16.mxu0 %v879_v0 }
  0x6e   : > { %637 = vmatpush3.bf16.msra.mxu0 %v636_v16 }
  0x6f   : > { %638 = vmatprep.subr.bf16.mxu0 %v879_v0 }
  0x72   : > { %640 = vmatpush3.bf16.msra.mxu0 %v639_v19 }
  0x73   : > { %641 = vmatprep.subr.bf16.mxu0 %v879_v0 }
  0x76   : > { %643 = vmatpush3.bf16.msra.mxu0 %v642_v22 }
  0x77   : > { %644 = vmatprep.subr.bf16.mxu0 %v879_v0 }
  0x7a   : > { %646 = vmatpush3.bf16.msra.mxu0 %v645_v25 }
  0x7d   : > { %621 = vmatmul.mubr.f32.vlgmr.msra.gmra.mrb[0].mxu0 %v299_v26 }
 0x150   : > { %v386_v28 = vpop.f32.mrb[0].mxu0 }
 0x151   : > { %v405_v29 = vadd.f32 %v564_v27, %v386_v28  ;;  %v622_v30 = vpop.f32.mrb[1].mxu0 }
 0x153   : > { %406 = vadd.xlane.f32.xlu0 %v405_v29 }
 0x1e0   : > { %v407_v33 = vpop.xlane.xlu0 %406 }
 0x1e1   : > { %v408_v34 = vmul.f32 0.03125, %v407_v33 }
 0x1e3   : > { %v409_v35 = vsub.f32 %v405_v29, %v408_v34 }
 0x1e5   : > { %v413_v36 = vsel %vm412_vm1, %v409_v35, 0.0 }
 0x1e6   : > { %v414_v37 = vmul.f32 %v413_v36, %v413_v36 }
 0x1e8   : > { %415 = vadd.xlane.f32.xlu0 %v414_v37 }
 0x275   : > { %v416_v38 = vpop.xlane.xlu0 %415 }
 0x276   : > { %v417_v39 = vmul.f32 0.03125, %v416_v38 }
 0x278   : > { %v418_v40 = vadd.f32 1e-05, %v417_v39 }
 0x27a   : > { %725 = vrsqrt.f32 %v418_v40 }
 0x284   : > { %v726_v41 = vpop.eup %725 }
 0x285   : > { %v420_v43 = vmul.f32 %v726_v41, %v413_v36 }
 0x287   : > { %v428_v45 = vmul.f32 %v565_v42, %v420_v43 }
 0x289   : > { %v436_v46 = vadd.f32 %v566_v44, %v428_v45 }
 0x28b   : > { %727 = vtanh.f32 %v436_v46 }
 0x295   : > { %v728_v47 = vpop.eup %727 }
 0x296   : > { %v439_v48 = vadd.f32 %v728_v47, %v299_v26 }
 0x298   : > { %440 = vst [vmem:[%s284_s7] sm:$0xff] %v439_v48 }
 0x299   : > { %800 = shalt.err (!%p797_p5)
}
 0x29a   : > { %s801_s8 = scalar_lea.hbm %s1094_s12, 128  ;;  %s805_s6 = scalar_lea.hbm %s1148_s5, 256 }
 0x29b   : > { %p802_p9 = scmp.ne.s32.totalorder %s1094_s12, %s801_s8  ;;  %p806_p7 = scmp.lt.u32.totalorder %s1094_s12, %s1148_s5 }
 0x29c   : > { %p807_p3 = scmp.lt.u32.totalorder %s805_s6, %s801_s8  ;;  %p809_p4 = scmp.lt.u32.totalorder %s801_s8, %s1094_s12 }
 0x29d   : > { %p803_p1 = pnand %p802_p9, %p1009_p10 }
 0x29e   : > { %p808_p13 = por %p807_p3, %p806_p7 }
 0x29f   : > { %p804_p2 = pneg %p803_p1 }
 0x2a0   : > { %p810_p6 = por %p809_p4, %p808_p13 }
 0x2a2   : > { %p811_p8 = pnand %p810_p6, %p804_p2 }
 0x2a4   : > { %814 = shalt.err (!%p811_p8)
}
 0x2a5   : > { %653 = dma.vmem_to_hbm [thread:$0]  (%p1009_p10), %s1096_s27, 128, %s1094_s12, %s442_s24  }
 0x2a6 PF: > { %s467_s7 = sand.u32 1, %s853_s18   ;;  %p1166_p12 = scmp.ne.s32.totalorder %s1156_s29, 0 }
 0x2a7   : > { %p1167_p11 = scmp.ge.s32.totalorder %s873_s23, 2  ;;  %s468_s14 = scalar_lea.sflag [#allocation5], %s467_s7 }
 0x2a9   : > { %p664_p0 = pnand %p1167_p11, %p1166_p12 }
 0x2ab   : > { %848 = dma.done.wait (!%p664_p0), %s468_s14, 128  }
 0x2ac   : > { %850 = vsyncadd (!%p664_p0), %s468_s14, 4294967168  ;;  %s22_s23 = sadd.s32 1, %s873_s23   ;;  %s1168_s18 = smov %s857_s19 }
 0x2ad   : > { %p19_p5 = scmp.ge.s32.totalorder %s22_s23, 4   ;;  %s1169_s19 = smov %s861_s20 }
 0x2ae   : > { %s1170_s20 = smov %s1018_s15  ;;  %s1171_s21 = smov %s869_s22 }
 0x2af   : > { %s1172_s22 = smov %s1174_s9  ;;  %21 = sbr.rel (!%p19_p5) target bundleno = 7 (0x7), region = 101 }
 0x2b6   :  { %473 = vsyncpa [#allocation4], 1 }
 0x2b7   :  { %475 = vsyncpa [#allocation4 + $0x1], 1 }
 0x2b8   :  { %476 = vsyncpa [#allocation7], 1 }
 0x2b9   :  { %477 = vsyncpa [#allocation5], 1 }
 0x2ba   :  { %479 = vsyncpa [#allocation5 + $0x1], 1 }

</bundles_post_ra>
